<compile_context>
chip_gen: v5e
topology: v5e:2x2
jax: 0.10.0
libtpu: 0.0.40
codegen_flags: <defaults>
</compile_context>

<pallas_src>
import jax
import jax.numpy as jnp
from jax.experimental import pallas as pl
from jax.experimental.pallas import tpu as pltpu

# ---- scaled-down SiamMask dimensions (synthetic; real model uses ResNet-50,
#      255/127 crops, 63x63 masks) ----
C = 128                  # feature channels (lane-aligned)
P = 8                    # patch / stride of the synthetic feature extractor
IMG = 64                 # search image spatial size  -> 8x8 feature grid
TMPL = 32                # template crop spatial size -> 4x4 feature grid
HX = WX = IMG // P       # 8
HZ = WZ = TMPL // P      # 4
HO = WO = HX - HZ + 1    # 5 : depthwise-xcorr output grid
NLOC = HO * WO           # 25 locations
ROWS_PAD = 32            # 25 -> 32 (4 full sublane groups, unmasked loads/stores)
A = 5                    # anchors per location
CLS_DIM = 2 * A          # (neg, pos) logits per anchor
CLS_PAD = 128            # lane-dense padded anchor-score head
MH = MW = 16             # per-location mask resolution (63x63 in the real model)
M_DIM = MH * MW          # 256
SEG_THR = 0.35           # cfg['hp'].seg_thr


# ---------------- Pallas kernels ----------------

def _feature_kernel(patch_ref, wf_ref, bf_ref, out_ref):
    # patch_ref: (N, P*P*3) f32, wf_ref: (P*P*3, C) bf16, bf_ref: (1, C) f32
    acc = jnp.dot(patch_ref[...].astype(jnp.bfloat16), wf_ref[...],
                  preferred_element_type=jnp.float32)
    out_ref[...] = jnp.maximum(acc + bf_ref[...], 0.0)


def _track_kernel(patch_ref, zf_ref, wf_ref, bf_ref, ws_ref, bs_ref,
                  wm_ref, bm_ref, out_ref):
    # --- fused search-branch feature extraction (xf never leaves VMEM) ---
    xf = jnp.maximum(
        jnp.dot(patch_ref[...].astype(jnp.bfloat16), wf_ref[...],
                preferred_element_type=jnp.float32) + bf_ref[...], 0.0)   # (64, C) f32
    xf3 = xf.reshape(HX, WX, C)                                           # (8, 8, C)
    zf = zf_ref[...]                                                      # (HZ*WZ, C) f32

    # --- depthwise cross-correlation: 16 full-slab FMAs, f32 on the VPU ---
    #   corr[i, j, c] = sum_{p,q} xf[i+p, j+q, c] * zf[p*WZ+q, c]
    corr = xf3[0:HO, 0:WO, :] * zf[0, :]
    for p in range(HZ):
        for q in range(WZ):
            if p == 0 and q == 0:
                continue
            corr = corr + xf3[p:p + HO, q:q + WO, :] * zf[p * WZ + q, :]

    # --- flatten to (25, C) and zero-pad to 32 rows (stays in registers) ---
    rows = [corr[i] for i in range(HO)]
    rows.append(jnp.zeros((ROWS_PAD - NLOC, C), jnp.float32))
    corr_pad = jnp.concatenate(rows, axis=0)                              # (32, C) f32
    corr_bf = corr_pad.astype(jnp.bfloat16)

    # --- anchor-score head: columns 0..A-1 hold (pos - neg) logit weights,
    #     remaining lanes are zero weights with -1e30 bias (lane-dense) ---
    scores = jnp.dot(corr_bf, ws_ref[...],
                     preferred_element_type=jnp.float32) + bs_ref[...]    # (32, 128)
    row_best = jnp.max(scores, axis=1, keepdims=True)                     # (32, 1)
    rid = jax.lax.broadcasted_iota(jnp.float32, (ROWS_PAD, 1), 0)
    row_best = jnp.where(rid < float(NLOC), row_best,
                         jnp.full_like(row_best, -3e38))                  # kill pad rows
    best_val = jnp.max(row_best, keepdims=True)                           # (1, 1)
    best_idx = jnp.min(jnp.where(row_best >= best_val, rid,
                                 jnp.full_like(rid, float(NLOC))),
                       keepdims=True)                                     # (1, 1)
    onehot = (rid == best_idx).astype(jnp.float32)                        # (32, 1)

    # --- mask head only for the winning location: (1, C) @ (C, M_DIM) ---
    best_corr = jnp.sum(corr_pad * onehot, axis=0, keepdims=True)         # (1, C)
    out_ref[...] = (jnp.dot(best_corr.astype(jnp.bfloat16), wm_ref[...],
                            preferred_element_type=jnp.float32) + bm_ref[...])


# ---------------- pallas_call wrappers (no grid, full-array VMEM specs) ----------------

_VMEM = pl.BlockSpec(memory_space=pltpu.MemorySpace.VMEM)


@jax.jit
def _feature_call(patches, w_feat, b_feat):
    n = patches.shape[0]
    return pl.pallas_call(
        _feature_kernel,
        in_specs=[_VMEM, _VMEM, _VMEM],
        out_specs=_VMEM,
        out_shape=jax.ShapeDtypeStruct((n, C), jnp.float32),
    )(patches, w_feat, b_feat)


@jax.jit
def _track_call(patches, zf, w_feat, b_feat, w_score, b_score, w_mask, b_mask):
    return pl.pallas_call(
        _track_kernel,
        in_specs=[_VMEM] * 8,
        out_specs=_VMEM,
        out_shape=jax.ShapeDtypeStruct((1, M_DIM), jnp.float32),
    )(patches, zf, w_feat, b_feat, w_score, b_score, w_mask, b_mask)


# ---------------- glue ----------------

def _patchify(img_chw):
    # (3, H, W) -> (H/P * W/P, P*P*3); stays as XLA glue (pure layout work).
    c, h, w = img_chw.shape
    x = jnp.transpose(img_chw, (1, 2, 0))                       # HWC
    x = x.reshape(h // P, P, w // P, P, c)
    x = jnp.transpose(x, (0, 2, 1, 3, 4))
    return x.reshape((h // P) * (w // P), P * P * c)


class SiamMaskModel:
    """Synthetic, scaled-down SiamMask tracker (deterministic weights)."""

    def __init__(self):
        # TODO(synk): real module loads a ResNet-50 Custom(anchors=...) checkpoint;
        # here weights are deterministic random tensors of the simplified heads.
        k1, k2, k3, k4 = jax.random.split(jax.random.PRNGKey(42), 4)
        w_feat = jax.random.normal(k1, (P * P * 3, C), jnp.float32) * 0.05
        b_feat = jax.random.normal(k4, (1, C), jnp.float32) * 0.01
        w_cls = jax.random.normal(k2, (C, CLS_DIM), jnp.float32) * 0.05
        b_cls = jnp.zeros((1, CLS_DIM), jnp.float32)
        w_mask = jax.random.normal(k3, (C, M_DIM), jnp.float32) * 0.05
        b_mask = jnp.zeros((1, M_DIM), jnp.float32)

        # bf16 MXU operands; accumulation stays f32 inside the kernels.
        self.w_feat = w_feat.astype(jnp.bfloat16)
        self.b_feat = b_feat

        # Anchor-score head: since argmax(softmax(neg,pos)[pos]) == argmax(pos-neg),
        # fold cls into a single lane-dense "pos minus neg" head padded to 128 lanes
        # (pad lanes: zero weights, -1e30 bias so they never win the row max).
        # Interleaved (neg, pos) anchor layout, matching the reference reshape (.., A, 2).
        w_pos, w_neg = w_cls[:, 1::2], w_cls[:, 0::2]
        b_pos, b_neg = b_cls[:, 1::2], b_cls[:, 0::2]
        w_score = jnp.zeros((C, CLS_PAD), jnp.float32).at[:, :A].set(w_pos - w_neg)
        b_score = jnp.full((1, CLS_PAD), -1e30, jnp.float32).at[:, :A].set(b_pos - b_neg)
        self.w_score = w_score.astype(jnp.bfloat16)
        self.b_score = b_score

        self.w_mask = w_mask.astype(jnp.bfloat16)
        self.b_mask = b_mask
        self.state = None

    def initialize(self, image, roi):
        # image: (3, IMG, IMG) float32 CHW; roi = ((x1, y1), (x2, y2)), TMPLxTMPL extent.
        (x1, y1), (x2, y2) = roi
        crop = image[:, y1:y2, x1:x2]                        # (3, TMPL, TMPL)
        patches = _patchify(crop)                            # (HZ*WZ, P*P*3)
        zf = _feature_call(patches, self.w_feat, self.b_feat)  # (HZ*WZ, C) template feats
        self.state = {"zf": zf, "seg_thr": SEG_THR}

    def forward(self, image):
        patches = _patchify(image)                           # (HX*WX, P*P*3)
        # Single fused kernel: features + depthwise xcorr + score head + argmax
        # + mask head of the winning location -> (1, M_DIM) logits.
        mask_logits = _track_call(patches, self.state["zf"],
                                  self.w_feat, self.b_feat,
                                  self.w_score, self.b_score,
                                  self.w_mask, self.b_mask)
        # TODO(synk): scale/ratio penalty + cosine window + refine module +
        # crop_back to full image resolution are not reproduced.
        mask_prob = jax.nn.sigmoid(mask_logits[0]).reshape(MH, MW)
        mask = (mask_prob > self.state["seg_thr"]).astype(jnp.float32)
        return mask[None]                                    # == .unsqueeze(0).float()


if __name__ == "__main__":
    key = jax.random.PRNGKey(0)
    image = jax.random.uniform(key, (3, IMG, IMG), dtype=jnp.float32)

    model = SiamMaskModel()
    model.initialize(image, ((16, 16), (16 + TMPL, 16 + TMPL)))
    out = model.forward(image)
    out = jax.block_until_ready(out)

    assert out.shape == (1, MH, MW), out.shape
    assert out.dtype == jnp.float32
    print("KERNEL_OK")
</pallas_src>

<mosaic_0001>
module attributes {stable_mosaic.version = 11 : i64} {
  func.func @_feature_kernel(%arg0: memref<16x192xf32, #tpu.memory_space<vmem>>, %arg1: memref<192x128xbf16, #tpu.memory_space<vmem>>, %arg2: memref<1x128xf32, #tpu.memory_space<vmem>>, %arg3: memref<16x128xf32, #tpu.memory_space<vmem>>) attributes {dimension_semantics = [], scalar_prefetch = 0 : i64, scratch_operands = 0 : i64, tpu.core_type = #tpu.core_type<tc>} {
    %c0 = arith.constant 0 : index
    %c0_0 = arith.constant 0 : index
    %0 = vector.load %arg0[%c0, %c0_0] : memref<16x192xf32, #tpu.memory_space<vmem>>, vector<16x192xf32>
    %1 = arith.truncf %0 : vector<16x192xf32> to vector<16x192xbf16>
    %c0_1 = arith.constant 0 : index
    %c0_2 = arith.constant 0 : index
    %2 = vector.load %arg1[%c0_1, %c0_2] : memref<192x128xbf16, #tpu.memory_space<vmem>>, vector<192x128xbf16>
    %cst = arith.constant dense<0.000000e+00> : vector<16x128xf32>
    %3 = tpu.matmul %1, %2, %cst {dimension_numbers = #tpu.dot_dimension_numbers<[1], [0], [0], [1], [0, 0, 1, 1], [], []>} : vector<16x192xbf16>, vector<192x128xbf16>, vector<16x128xf32> -> vector<16x128xf32>
    %c0_3 = arith.constant 0 : index
    %c0_4 = arith.constant 0 : index
    %4 = vector.load %arg2[%c0_3, %c0_4] : memref<1x128xf32, #tpu.memory_space<vmem>>, vector<1x128xf32>
    %5 = vector.broadcast %4 : vector<1x128xf32> to vector<16x128xf32>
    %6 = arith.addf %3, %5 : vector<16x128xf32>
    %cst_5 = arith.constant 0.000000e+00 : f32
    %7 = vector.broadcast %cst_5 : f32 to vector<16x128xf32>
    %8 = arith.maximumf %6, %7 : vector<16x128xf32>
    %c0_6 = arith.constant 0 : index
    %c0_7 = arith.constant 0 : index
    %9 = vector.load %arg3[%c0_6, %c0_7] : memref<16x128xf32, #tpu.memory_space<vmem>>, vector<16x128xf32>
    tpu.vector_store %arg3[%c0_6, %c0_7], %8 {strides = array<i32>} : memref<16x128xf32, #tpu.memory_space<vmem>>, vector<16x128xf32>,
    return
  }
}

</mosaic_0001>

<bundles_post_ra>
// kernel: _feature_call.1
= control target key start
LH: loop header
LB: loop body
LE: loop exit
PB: predicated region body
PF: predicated region fallthrough
CT: control target
= control target key end

     0   :  { %8 = vsyncpa [#allocation3], 0  ;;  %s400_s0 = inlined_call_operand.hbm [shape: f32[16,192], index: 0, kind: input, shape index: {}]   ;;  %s401_s1 = inlined_call_operand.hbm [shape: bf16[192,128], index: 1, kind: input, shape index: {}]   ;;  %s402_s2 = inlined_call_operand.vmem [shape: f32[1,128], index: 2, kind: input, shape index: {}]   ;;  %s403_s3 = inlined_call_operand.hbm [shape: f32[16,128], index: 3, kind: output, shape index: {}]  }
   0x1   :  { %9 = vsyncpa [#allocation6], 0 }
   0x2   :  { %10 = vsyncpa [#allocation4], 0  ;;  %s15_s14 = sshll.u32 %s400_s0, 4  ;;  %s359_s15 = smov [#allocation2]   ;;  %s16_s14 = int_to_ptr.hbm [resolvable:$true] %s15_s14 }
   0x3   :  { %s17_s16 = sshll.u32 %s359_s15, 4  ;;  %s28_s19 = sshll.u32 %s401_s1, 4  ;;  %s18_s16 = int_to_ptr.vmem [resolvable:$true] %s17_s16  ;;  %s29_s19 = int_to_ptr.hbm [resolvable:$true] %s28_s19 }
   0x4   :  { %s360_s20 = smov 256   ;;  %s361_s21 = smov 16  }
   0x5   :  { %23 = dma.hbm_to_vmem [thread:$0]  %s16_s14, 512, %s18_s16, [#allocation3], %s360_s20, %s360_s20, %s361_s21  }
   0x6   :  { %s362_s22 = smov [#allocation5]   ;;  %s363_s24 = smov 64  }
   0x7   :  { %s30_s23 = sshll.u32 %s362_s22, 4  ;;  %s364_s25 = smov 4   ;;  %s31_s23 = int_to_ptr.vmem [resolvable:$true] %s30_s23 }
   0x8   :  { %36 = dma.hbm_to_vmem [thread:$0]  %s29_s19, 1536, %s31_s23, [#allocation6], %s363_s24, %s363_s24, %s364_s25  }
   0x9   :  { %353 = dma.done.wait [#allocation3], 512  }
   0xa   :  { %354 = vsyncadd [#allocation3], 4294966784 }
   0xb   :  { %355 = dma.done.wait [#allocation6], 1536  }
   0xc   :  { %356 = vsyncadd [#allocation6], 4294965760  ;;  %v266_v0 = vld [vmem:[#allocation5 + $0x38] sm:$0xff]  ;;  %v265_v2 = vld [vmem:[#allocation5 + $0x30] sm:$0xff]  ;;  %vm154_vm0 = vcmask 523264   ;;  %s365_s26 = smov [#allocation7]  }
   0xd   :  { %v270_v1 = vld [vmem:[#allocation5 + $0x58] sm:$0xff]  ;;  %158 = vmatpush.bf16.msra.mxu0 %v266_v0  ;;  %v269_v3 = vld [vmem:[#allocation5 + $0x50] sm:$0xff]  ;;  %v264_v4 = vld [vmem:[#allocation5 + $0x28] sm:$0xff]  ;;  %s194_s27 = sshll.u32 %s365_s26, 4  ;;  %s196_s30 = sshll.u32 %s403_s3, 4  ;;  %s195_s27 = int_to_ptr.vmem [resolvable:$true] %s194_s27  ;;  %s197_s30 = int_to_ptr.hbm [resolvable:$true] %s196_s30 }
   0xe   :  { %176 = vmatpush.bf16.msra.mxu1 %v270_v1  ;;  %v268_v5 = vld [vmem:[#allocation5 + $0x48] sm:$0xff]  ;;  %v263_v6 = vld [vmem:[#allocation5 + $0x20] sm:$0xff]  ;;  %v51_v9 = vld [vmem:[#allocation2 + $0x18] sm:$0xff]  ;;  %s367_s4 = smov 8  }
   0xf   :  { %v267_v7 = vld [vmem:[#allocation5 + $0x40] sm:$0xff]  ;;  %v49_v8 = vld [vmem:[#allocation2 + $0x8] sm:$0xff]  ;;  %v262_v10 = vld [vmem:[#allocation5 + $0x18] sm:$0xff] }
  0x10   :  { %v53_v11 = vpack.c.bf16 %v51_v9, %v49_v8  ;;  %v261_v12 = vld [vmem:[#allocation5 + $0x10] sm:$0xff]  ;;  %v260_v13 = vld [vmem:[#allocation5 + $0x8] sm:$0xff]  ;;  %v259_v14 = vld [vmem:[#allocation5] sm:$0xff] }
  0x11   :  { %159 = vmatpush.bf16.msra.mxu0 %v265_v2  ;;  %v48_v15 = vld [vmem:[#allocation2] sm:$0xff]  ;;  %v50_v16 = vld [vmem:[#allocation2 + $0x10] sm:$0xff] }
  0x12   :  { %177 = vmatpush.bf16.msra.mxu1 %v269_v3  ;;  %v52_v17 = vpack.c.bf16 %v50_v16, %v48_v15  ;;  %v280_v18 = vld [vmem:[%s402_s2] ss:$0 sm:$0xff]  ;;  %s366_s2 = smov 128  }
  0x15   :  { %160 = vmatpush.bf16.msra.mxu0 %v264_v4 }
  0x16   :  { %178 = vmatpush.bf16.msra.mxu1 %v268_v5 }
  0x19   :  { %161 = vmatpush.bf16.msra.mxu0 %v263_v6 }
  0x1a   :  { %179 = vmatpush.bf16.msra.mxu1 %v267_v7 }
  0x1d   :  { %162 = vmatpush.bf16.msra.mxu0 %v262_v10  ;;  %258 = vmatmul.msk.bf16.vlgmr.msra.gmra.mxu1 %vm154_vm0, %v53_v11 }
  0x21   :  { %163 = vmatpush.bf16.msra.mxu0 %v261_v12 }
  0x25   :  { %164 = vmatpush.bf16.msra.mxu0 %v260_v13 }
  0x29   :  { %165 = vmatpush.bf16.msra.mxu0 %v259_v14 }
  0x2c   :  { %166 = vmatmul.bf16.vlgmr.msra.gmra.mxu0 %v52_v17 }
  0x9a   :  { %v181_v19 = vpop.f32.mrf.mxu1 }
  0xa2   :  { %v183_v26 = vpop.f32.mrf.mxu1 }
  0xa9   :  { %v167_v20 = vpop.f32.mrf.mxu0 }
  0xaa   :  { %v168_v21 = vadd.f32 %v280_v18, %v167_v20 }
  0xac   :  { %v182_v22 = vadd.f32 %v181_v19, %v168_v21 }
  0xae   :  { %v186_v23 = vmax.f32 %v182_v22, 0.0 }
  0xb0   :  { %188 = vst [vmem:[#allocation7] sm:$0xff] %v186_v23 }
  0xb1   :  { %v169_v24 = vpop.f32.mrf.mxu0 }
  0xb2   :  { %v170_v25 = vadd.f32 %v280_v18, %v169_v24 }
  0xb4   :  { %v184_v27 = vadd.f32 %v183_v26, %v170_v25 }
  0xb6   :  { %v187_v28 = vmax.f32 %v184_v27, 0.0 }
  0xb8   :  { %189 = vst [vmem:[#allocation7 + $0x8] sm:$0xff] %v187_v28 }
  0xb9   :  { %202 = dma.vmem_to_hbm [thread:$0]  %s195_s27, 256, %s197_s30, [#allocation4], %s366_s2, %s366_s2, %s367_s4  }
  0xba   :  { %357 = dma.done.wait [#allocation4], 256  }
  0xbb   :  { %358 = vsyncadd [#allocation4], 4294967040 }
  0xbc   :  { %207 = vsyncpa [#allocation3], 1 }
  0xbd   :  { %208 = vsyncpa [#allocation6], 1 }
  0xbe   :  { %209 = vsyncpa [#allocation4], 1 }

</bundles_post_ra>
